<compile_context>
chip_gen: v6e
topology: v6e:2x2x1
jax: 0.10.0
libtpu: 0.0.40
codegen_flags: <defaults>
</compile_context>

<pallas_src>
import functools

import jax
import jax.numpy as jnp
from jax.experimental import pallas as pl
from jax.experimental.pallas import tpu as pltpu


def _cdiv(a, b):
    return -(-a // b)


def _round_up(n, m):
    return _cdiv(n, m) * m


def _choose_batch_tile(batch, block_b):
    # Cap at ceil(B/2) so the batch axis splits into >=2 tiles whenever possible
    # (v7x megacore), keep rows a multiple of 16 (safe sublane tile for f32 and bf16).
    tb = min(int(block_b), max(_cdiv(batch, 2), 8))
    return _round_up(max(tb, 8), 16)


def _vmem_limit_bytes():
    default = 32 * 1024 * 1024
    try:
        cap = getattr(pltpu.get_tpu_info(), "vmem_capacity_bytes", None)
    except Exception:  # pragma: no cover - defensive; keep kernel runnable anywhere
        return default
    if not cap:
        return default
    # ~75% of physical VMEM, capped at 96 MiB: 96 MiB on v5e/v6e, 48 MiB on v7x.
    return int(min(96 * 1024 * 1024, max(default, (3 * cap) // 4)))


def _mlp_kernel(idx_ref, x_ref, w1_ref, b1_ref, w2_ref, b2_ref, o_ref):
    # idx_ref : SMEM (1,) int32 -- layer index (also consumed by weight index_maps)
    # x_ref   : VMEM (TB, D)    -- one batch tile (f32 or bf16)
    # w1_ref  : VMEM (D, H)     -- layer `idx` only (selected by the index_map)
    # b1_ref  : VMEM (1, H)     f32
    # w2_ref  : VMEM (1, H)     f32 (second Linear weight, row-major)
    # b2_ref  : SMEM (L,)       f32 (second Linear bias, scalar per layer)
    # o_ref   : VMEM (TB, 1)    f32
    # First Linear on the MXU with f32 accumulation; ReLU on the VPU.
    h = jnp.dot(x_ref[...], w1_ref[...], preferred_element_type=jnp.float32)  # (TB, H)
    h = jnp.maximum(h + b1_ref[...], 0.0)

    # Second Linear (H -> 1): VPU multiply + XLU lane reduce (an N=1 MXU matmul would
    # waste the whole systolic array and a result-FIFO pop).
    y = jnp.sum(h * w2_ref[...], axis=-1, keepdims=True)                      # (TB, 1)
    y = y + b2_ref[idx_ref[0]]

    o_ref[...] = jax.nn.sigmoid(y).astype(o_ref.dtype)


@functools.partial(jax.jit, static_argnames=("block_b", "compute_dtype"))
def mlp_layers_forward(x, w1s, b1s, w2s, b2s, layer_idx, *, block_b=4096,
                       compute_dtype=jnp.float32):
    B, D = x.shape
    L, _, H = w1s.shape
    compute_dtype = jnp.dtype(compute_dtype)

    # Feed the matmul operands in the compute dtype *before* the DMA (halves the
    # HBM-bound x stream on the bf16 path; no per-step in-kernel cast of the W1 tile).
    if x.dtype != compute_dtype:
        x = x.astype(compute_dtype)
    if w1s.dtype != compute_dtype:
        w1s = w1s.astype(compute_dtype)
    b1s = b1s.astype(jnp.float32)
    w2s = w2s.astype(jnp.float32)
    b2s = b2s.astype(jnp.float32)

    tb = _choose_batch_tile(B, block_b)
    nb = _cdiv(B, tb)   # ragged last block: reads padded, out-of-range writes masked

    idx = jnp.asarray([layer_idx], dtype=jnp.int32)

    grid_spec = pltpu.PrefetchScalarGridSpec(
        num_scalar_prefetch=1,
        grid=(nb,),
        in_specs=[
            # x: one TB-row tile per grid step (software pipelined).
            pl.BlockSpec((tb, D), lambda i, idx_ref: (i, 0)),
            # Per-layer weights: constant block index across the grid -> fetched once,
            # VMEM-resident for every batch tile.
            pl.BlockSpec((None, D, H), lambda i, idx_ref: (idx_ref[0], 0, 0)),
            pl.BlockSpec((None, 1, H), lambda i, idx_ref: (idx_ref[0], 0, 0)),
            pl.BlockSpec((None, 1, H), lambda i, idx_ref: (idx_ref[0], 0, 0)),
            # b2: tiny per-layer scalar table, kept whole in SMEM.
            pl.BlockSpec(memory_space=pltpu.MemorySpace.SMEM),
        ],
        out_specs=pl.BlockSpec((tb, 1), lambda i, idx_ref: (i, 0)),
    )

    itemsize = compute_dtype.itemsize
    flops = 2 * B * D * H + 3 * B * H
    bytes_accessed = B * D * itemsize + 4 * B + D * H * itemsize + 4 * (2 * H + L)

    out = pl.pallas_call(
        _mlp_kernel,
        out_shape=jax.ShapeDtypeStruct((B, 1), jnp.float32),
        grid_spec=grid_spec,
        compiler_params=pltpu.CompilerParams(
            dimension_semantics=("parallel",),        # batch tiles shard across TCs
            vmem_limit_bytes=_vmem_limit_bytes(),
        ),
        cost_estimate=pl.CostEstimate(
            flops=flops, transcendentals=2 * B, bytes_accessed=bytes_accessed),
    )(idx, x, w1s, b1s, w2s, b2s)

    return out


def init_mlp_layers_params(key, input_dim, hidden_dim, num_layers):
    """Xavier-normal weights, zero biases (matches nn.init.xavier_normal_ / constant_(0))."""
    k1, k2 = jax.random.split(key)
    std1 = (2.0 / (input_dim + hidden_dim)) ** 0.5
    std2 = (2.0 / (hidden_dim + 1)) ** 0.5
    # PyTorch Linear weight is (out, in); stored transposed / row-major for x @ W.
    w1s = std1 * jax.random.normal(k1, (num_layers, input_dim, hidden_dim), jnp.float32)
    w2s = std2 * jax.random.normal(k2, (num_layers, 1, hidden_dim), jnp.float32)
    b1s = jnp.zeros((num_layers, 1, hidden_dim), jnp.float32)
    b2s = jnp.zeros((num_layers,), jnp.float32)
    return w1s, b1s, w2s, b2s


def _reference_forward(x, w1s, b1s, w2s, b2s, layer_idx):
    h = jnp.maximum(x @ w1s[layer_idx] + b1s[layer_idx], 0.0)
    y = h @ w2s[layer_idx].T + b2s[layer_idx]
    return jax.nn.sigmoid(y)


if __name__ == "__main__":
    input_dim, hidden_dim, num_layers = 16, 32, 3
    batch = 200            # not a multiple of the batch tile -> exercises the ragged block
    layer_idx = 1

    key = jax.random.PRNGKey(0)
    kx, kp = jax.random.split(key)
    x = jax.random.normal(kx, (batch, input_dim), jnp.float32)
    w1s, b1s, w2s, b2s = init_mlp_layers_params(kp, input_dim, hidden_dim, num_layers)

    ref = _reference_forward(x, w1s, b1s, w2s, b2s, layer_idx)

    # f32 path (exact semantics of the PyTorch module). With the default block_b the
    # batch still splits into 2 tiles (ceil(B/2) cap) so both v7x cores get work.
    out = mlp_layers_forward(x, w1s, b1s, w2s, b2s, layer_idx)
    out = jax.block_until_ready(out)
    assert out.shape == (batch, 1)
    assert jnp.allclose(out, ref, atol=1e-5, rtol=1e-5), "f32 kernel mismatch"

    # bf16 MXU fast path (x / W1 cast in the wrapper, f32 accumulation), looser tolerance.
    out_bf16 = mlp_layers_forward(x, w1s, b1s, w2s, b2s, layer_idx,
                                  compute_dtype=jnp.bfloat16)
    out_bf16 = jax.block_until_ready(out_bf16)
    assert out_bf16.shape == (batch, 1)
    assert jnp.allclose(out_bf16, ref, atol=3e-2, rtol=3e-2), "bf16 kernel mismatch"

    print("KERNEL_OK")
</pallas_src>

<mosaic_0001>
module attributes {stable_mosaic.version = 11 : i64} {
  func.func @_mlp_kernel(%arg0: i32, %arg1: memref<1xi32, #tpu.memory_space<smem>>, %arg2: memref<112x16xf32, #tpu.memory_space<vmem>>, %arg3: memref<1x16x32xf32, #tpu.memory_space<vmem>>, %arg4: memref<1x1x32xf32, #tpu.memory_space<vmem>>, %arg5: memref<1x1x32xf32, #tpu.memory_space<vmem>>, %arg6: memref<3xf32, #tpu.memory_space<smem>>, %arg7: memref<112x1xf32, #tpu.memory_space<vmem>>) attributes {dimension_semantics = [#tpu.dimension_semantics<parallel>], iteration_bounds = array<i64: 2>, scalar_prefetch = 1 : i64, scratch_operands = 0 : i64, tpu.core_type = #tpu.core_type<tc>, window_params = [{transform_indices = @transform_0, window_bounds = array<i64: 112, 16>}, {transform_indices = @transform_1, window_bounds = array<i64: 1, 16, 32>}, {transform_indices = @transform_2, window_bounds = array<i64: 1, 1, 32>}, {transform_indices = @transform_3, window_bounds = array<i64: 1, 1, 32>}, {transform_indices = @transform_4, window_bounds = array<i64: 3>}, {transform_indices = @transform_5, window_bounds = array<i64: 112, 1>}]} {
    %c0 = arith.constant 0 : index
    %c0_0 = arith.constant 0 : index
    %0 = vector.load %arg2[%c0, %c0_0] : memref<112x16xf32, #tpu.memory_space<vmem>>, vector<112x16xf32>
    %c0_1 = arith.constant 0 : index
    %c0_2 = arith.constant 0 : index
    %c0_3 = arith.constant 0 : index
    %1 = vector.load %arg3[%c0_1, %c0_2, %c0_3] : memref<1x16x32xf32, #tpu.memory_space<vmem>>, vector<1x16x32xf32>
    %2 = vector.shape_cast %1 : vector<1x16x32xf32> to vector<16x32xf32>
    %cst = arith.constant dense<0.000000e+00> : vector<112x32xf32>
    %3 = tpu.matmul %0, %2, %cst {dimension_numbers = #tpu.dot_dimension_numbers<[1], [0], [0], [1], [0, 0, 1, 1], [], []>} : vector<112x16xf32>, vector<16x32xf32>, vector<112x32xf32> -> vector<112x32xf32>
    %c0_4 = arith.constant 0 : index
    %c0_5 = arith.constant 0 : index
    %c0_6 = arith.constant 0 : index
    %4 = vector.load %arg4[%c0_4, %c0_5, %c0_6] : memref<1x1x32xf32, #tpu.memory_space<vmem>>, vector<1x1x32xf32>
    %5 = vector.shape_cast %4 : vector<1x1x32xf32> to vector<1x32xf32>
    %6 = vector.broadcast %5 : vector<1x32xf32> to vector<112x32xf32>
    %7 = arith.addf %3, %6 : vector<112x32xf32>
    %cst_7 = arith.constant 0.000000e+00 : f32
    %8 = vector.broadcast %cst_7 : f32 to vector<112x32xf32>
    %9 = arith.maximumf %7, %8 : vector<112x32xf32>
    %c0_8 = arith.constant 0 : index
    %c0_9 = arith.constant 0 : index
    %c0_10 = arith.constant 0 : index
    %10 = vector.load %arg5[%c0_8, %c0_9, %c0_10] : memref<1x1x32xf32, #tpu.memory_space<vmem>>, vector<1x1x32xf32>
    %11 = vector.shape_cast %10 : vector<1x1x32xf32> to vector<1x32xf32>
    %12 = vector.broadcast %11 : vector<1x32xf32> to vector<112x32xf32>
    %13 = arith.mulf %9, %12 : vector<112x32xf32>
    %cst_11 = arith.constant dense<0.000000e+00> : vector<112xf32>
    %14 = vector.multi_reduction <add>, %13, %cst_11 [1] : vector<112x32xf32> to vector<112xf32>
    %15 = vector.shape_cast %14 : vector<112xf32> to vector<112x1xf32>
    %c0_12 = arith.constant 0 : index
    %16 = memref.load %arg1[%c0_12] : memref<1xi32, #tpu.memory_space<smem>>
    %17 = arith.index_cast %16 : i32 to index
    %18 = memref.load %arg6[%17] : memref<3xf32, #tpu.memory_space<smem>>
    %19 = vector.broadcast %18 : f32 to vector<112x1xf32>
    %20 = arith.addf %15, %19 : vector<112x1xf32>
    %21 = arith.negf %20 : vector<112x1xf32>
    %22 = math.exp %21 : vector<112x1xf32>
    %cst_13 = arith.constant 1.000000e+00 : f32
    %23 = vector.broadcast %cst_13 : f32 to vector<112x1xf32>
    %24 = arith.addf %23, %22 : vector<112x1xf32>
    %25 = arith.divf %23, %24 : vector<112x1xf32>
    %c0_14 = arith.constant 0 : index
    %c0_15 = arith.constant 0 : index
    %26 = vector.load %arg7[%c0_14, %c0_15] : memref<112x1xf32, #tpu.memory_space<vmem>>, vector<112x1xf32>
    tpu.vector_store %arg7[%c0_14, %c0_15], %25 {strides = array<i32>} : memref<112x1xf32, #tpu.memory_space<vmem>>, vector<112x1xf32>,
    return
  }
  func.func @transform_0(%arg0: i32, %arg1: memref<1xi32, #tpu.memory_space<smem>>) -> (i32, i32) {
    %c0_i32 = arith.constant 0 : i32
    %c0_i32_0 = arith.constant 0 : i32
    return %arg0, %c0_i32 : i32, i32
  }
  func.func @transform_1(%arg0: i32, %arg1: memref<1xi32, #tpu.memory_space<smem>>) -> (i32, i32, i32) {
    %c0 = arith.constant 0 : index
    %0 = memref.load %arg1[%c0] : memref<1xi32, #tpu.memory_space<smem>>
    %c0_i32 = arith.constant 0 : i32
    %c0_i32_0 = arith.constant 0 : i32
    %c0_i32_1 = arith.constant 0 : i32
    return %0, %c0_i32, %c0_i32_0 : i32, i32, i32
  }
  func.func @transform_2(%arg0: i32, %arg1: memref<1xi32, #tpu.memory_space<smem>>) -> (i32, i32, i32) {
    %c0 = arith.constant 0 : index
    %0 = memref.load %arg1[%c0] : memref<1xi32, #tpu.memory_space<smem>>
    %c0_i32 = arith.constant 0 : i32
    %c0_i32_0 = arith.constant 0 : i32
    %c0_i32_1 = arith.constant 0 : i32
    return %0, %c0_i32, %c0_i32_0 : i32, i32, i32
  }
  func.func @transform_3(%arg0: i32, %arg1: memref<1xi32, #tpu.memory_space<smem>>) -> (i32, i32, i32) {
    %c0 = arith.constant 0 : index
    %0 = memref.load %arg1[%c0] : memref<1xi32, #tpu.memory_space<smem>>
    %c0_i32 = arith.constant 0 : i32
    %c0_i32_0 = arith.constant 0 : i32
    %c0_i32_1 = arith.constant 0 : i32
    return %0, %c0_i32, %c0_i32_0 : i32, i32, i32
  }
  func.func @transform_4(%arg0: i32, %arg1: memref<1xi32, #tpu.memory_space<smem>>) -> i32 {
    %c0_i32 = arith.constant 0 : i32
    %c0_i32_0 = arith.constant 0 : i32
    return %c0_i32 : i32
  }
  func.func @transform_5(%arg0: i32, %arg1: memref<1xi32, #tpu.memory_space<smem>>) -> (i32, i32) {
    %c0_i32 = arith.constant 0 : i32
    %c0_i32_0 = arith.constant 0 : i32
    return %arg0, %c0_i32 : i32, i32
  }
}

</mosaic_0001>

<bundles_post_ra>
// kernel: mlp_layers_forward.1
= control target key start
LH: loop header
LB: loop body
LE: loop exit
PB: predicated region body
PF: predicated region fallthrough
CT: control target
= control target key end

     0   :  { %s1708_s0 = inlined_call_operand.<no memory space> [shape: s32[1], index: 0, kind: input, shape index: {}]   ;;  %s1709_s1 = inlined_call_operand.vmem [shape: f32[200,16], index: 1, kind: input, shape index: {}]   ;;  %s1710_s2 = inlined_call_operand.vmem [shape: f32[3,16,32], index: 2, kind: input, shape index: {}]   ;;  %s1711_s3 = inlined_call_operand.vmem [shape: f32[3,1,32], index: 3, kind: input, shape index: {}]   ;;  %s1712_s4 = inlined_call_operand.vmem [shape: f32[3,1,32], index: 4, kind: input, shape index: {}]   ;;  %s1713_s5 = inlined_call_operand.vmem [shape: f32[3], index: 5, kind: input, shape index: {}]   ;;  %s1714_s6 = inlined_call_operand.vmem [shape: f32[200,1], index: 6, kind: output, shape index: {}]  }
   0x1   :  { %11 = sst [smem:[#allocation3]] %s1708_s0 }
   0x2   :  { %12 = vsyncpa [#allocation5], 0  ;;  %s1452_s23 = smov 0   ;;  %s1454_s24 = smov 0  }
   0x3   :  { %s1456_s25 = smov 0  }
   0x4 LB: > { %s1465_s0 = sadd.s32 4294967295, %s1379_s25   ;;  %s1467_s26 = sadd.s32 1, %s1379_s25   ;;  %s1379_s25 = sphi %s1456_s25, %s1722_s25   ;;  %s1375_s24 = sphi %s1454_s24, %s1721_s24   ;;  %s1371_s23 = sphi %s1452_s23, %s1720_s23  }
   0x5   : > { %s153_s27 = ssub.s32 %s1379_s25, %s1467_s26  ;;  %s156_s28 = sadd.s32 1, %s1375_s24 }
   0x6   : > { %p154_p0 = scmp.eq.s32.totalorder %s153_s27, 0  ;;  %p166_p1 = scmp.ne.s32.totalorder %s1375_s24, %s1371_s23 }
   0x7   : > { %p167_p2 = scmp.eq.s32.totalorder %s1465_s0, 1  ;;  %p1048_p3 = scmp.ge.s32.totalorder %s1379_s25, 1 }
   0x8   : > { %s1475_s29 = scalar_select %p154_p0, %s1375_s24, %s156_s28  }
   0x9   : > { %p1477_p4 = por %p167_p2, %p166_p1  ;;  %p180_p5 = scmp.lt.s32.totalorder %s1379_s25, 3 }
   0xa   : > { %p1154_p6 = scmp.eq.s32.totalorder %s1465_s0, 0  ;;  %s219_s10 = sshll.u32 %s1713_s5, 4  ;;  %s220_s10 = int_to_ptr.vmem [resolvable:$true] %s219_s10 }
   0xb   : > { %p1482_p7 = pnand %p1048_p3, %p180_p5  ;;  %s1306_s11 = scalar_lea.vmem %s220_s10, 16 }
   0xc   : > { %p1307_p10 = scmp.ne.s32.totalorder %s220_s10, %s1306_s11  ;;  %p1314_p0 = scmp.lt.s32.totalorder %s220_s10, %s220_s10 }
   0xd   : > { %p1150_p8 = pneg %p1482_p7  ;;  %p1315_p1 = scmp.lt.s32.totalorder %s1306_s11, %s1306_s11 }
   0xf   : > { %p1151_p9 = pnand %p1154_p6, %p1150_p8  ;;  %p1316_p2 = por %p1315_p1, %p1314_p0 }
  0x11   : > { %p1308_p11 = pneg %p1151_p9 }
  0x13   : > { %p1309_p12 = pnand %p1308_p11, %p1307_p10 }
  0x15   : > { %p1310_p13 = pneg %p1309_p12 }
  0x17   : > { %p1317_p3 = pnand %p1316_p2, %p1310_p13 }
  0x19   : > { %1320 = shalt.err (!%p1317_p3)
}
  0x1a   : > { %s1413_s12 = smov [#allocation4]   ;;  %249 = sbr.rel (%p1482_p7) target bundleno = 504 (0x1f8), region = 40 }
  0x1b   : > { %1153 = dma.vmem_to_smem (!%p1151_p9), %s220_s10, 16, %s1413_s12, [#allocation5]  }
  0x1f   : > { %1366 = dma.done.wait (%p1154_p6), [#allocation5], 16  }
  0x20   : > { %1368 = vsyncadd (%p1154_p6), [#allocation5], 4294967280 }
  0x21   : > { %255 = sfence }
  0x22   : > { %s1499_s13 = sld [smem:[#allocation3]]  ;;  %s1502_s14 = smul.u32 14, %s1465_s0  ;;  %vm354_vm0 = vcmask 130048   ;;  %vm567_vm1 = vcmask 261120   ;;  %vm711_vm2 = vcmask 7168  }
  0x23   : > { %s1099_s17 = smul.u32 (%p1477_p4), 112, %s1465_s0 }
  0x24   : > { %p300_p5 = scmp.lt.s32.totalorder %s1502_s14, 24 }
  0x26   : > { %s301_s15 = scalar_select %p300_p5, %s1502_s14, 24 }
  0x28   : > { %p310_p8 = scmp.lt.s32.totalorder %s1499_s13, 2  ;;  %s1053_s16 = sshll.u32 %s301_s15, 3 }
  0x29   : > { %s1510_s19 = scalar_lea.vmem %s1709_s1, %s1053_s16  ;;  %s611_s12 = sld [smem:[#allocation4 + %s1499_s13]] }
  0x2a   : > { %s1513_s20 = scalar_select %p310_p8, %s1499_s13, 2  ;;  %v331_v0 = vld [vmem:[%s1510_s19] sm:$0xff]  ;;  %v332_v4 = vld [vmem:[%s1510_s19 + $0x8] sm:$0xff]  ;;  %v333_v6 = vld [vmem:[%s1510_s19 + $0x10] sm:$0xff] }
  0x2b   : > { %v339_v1 = vld [vmem:[%s1510_s19 + $0x40] sm:$0xff]  ;;  %1120 = vmatprep.mubr.msk.f32.mxu0 %vm354_vm0, %v331_v0  ;;  %v340_v5 = vld [vmem:[%s1510_s19 + $0x48] sm:$0xff]  ;;  %v341_v7 = vld [vmem:[%s1510_s19 + $0x50] sm:$0xff]  ;;  %s292_s13 = sand.u32 1, %s1371_s23   ;;  %s734_s16 = ssub.s32 (%p1477_p4), 25, %s1502_s14 }
  0x2c   : > { %1132 = vmatprep.mubr.msk.f32.mxu1 %vm354_vm0, %v339_v1  ;;  %s1098_s21 = sshll.u32 %s1513_s20, 4  ;;  %v334_v8 = vld [vmem:[%s1510_s19 + $0x18] sm:$0xff]  ;;  %v335_v10 = vld [vmem:[%s1510_s19 + $0x20] sm:$0xff]  ;;  %v336_v12 = vld [vmem:[%s1510_s19 + $0x28] sm:$0xff]  ;;  %s319_s8 = scalar_lea.vmem %s1711_s3, %s1513_s20 }
  0x2d   : > { %s314_s27 = scalar_lea.vmem %s1710_s2, %s1098_s21  ;;  %v342_v9 = vld [vmem:[%s1510_s19 + $0x58] sm:$0xff]  ;;  %v343_v11 = vld [vmem:[%s1510_s19 + $0x60] sm:$0xff]  ;;  %v344_v13 = vld [vmem:[%s1510_s19 + $0x68] sm:$0xff]  ;;  %s324_s11 = scalar_lea.vmem %s1712_s4, %s1513_s20 }
  0x2e   : > { %v346_v2 = vld [vmem:[%s314_s27 + $0x8] sm:$0xff]  ;;  %v345_v3 = vld [vmem:[%s314_s27] sm:$0xff]  ;;  %v337_v14 = vld [vmem:[%s1510_s19 + $0x30] sm:$0xff]  ;;  %s1145_s15 = smul.u32 112, %s292_s13  ;;  %p735_p6 = scmp.lt.s32.totalorder (%p1477_p4), %s734_s16, 14 }
  0x2f   : > { %1116 = vmatprep.subr.mxu0 %v346_v2  ;;  %1141 = vmatprep.subr.mxu1 %v346_v2  ;;  %v338_v15 = vld [vmem:[%s1510_s19 + $0x38] sm:$0xff]  ;;  %v1056_v16 = vld [vmem:[%s319_s8] ss:$0 sm:$0xff]  ;;  %s1624_s20 = scalar_lea.vmem (%p1477_p4), %s1714_s6, %s1099_s17  }
  0x30   : > { %1117 = vmatpush3.msra.mxu0 %v346_v2  ;;  %1143 = vmatpush3.msra.mxu1 %v346_v2  ;;  %v1555_v27 = vld [vmem:[%s324_s11] ss:$0 sm:$0xff]  ;;  %s1587_s23 = scalar_lea.vmem [#allocation6], %s1145_s15  }
  0x31   : > { %1118 = vmatprep.subr.mxu0 %v345_v3  ;;  %1142 = vmatprep.subr.mxu1 %v345_v3 }
  0x32   : > { %1119 = vmatpush3.msra.mxu0 %v345_v3  ;;  %1144 = vmatpush3.msra.mxu1 %v345_v3 }
  0x33   : > { %1121 = vmatmul.mubr.msk.f32.vlgmr.msra.gmra.mxu0 %vm354_vm0, %v332_v4  ;;  %1133 = vmatmul.mubr.msk.f32.vlgmr.msra.gmra.mxu1 %vm354_vm0, %v340_v5 }
  0x34   : > { %1123 = vmatprep.mubr.msk.f32.mxu0 %vm354_vm0, %v333_v6  ;;  %1135 = vmatprep.mubr.msk.f32.mxu1 %vm354_vm0, %v341_v7 }
  0x37   : > { %1124 = vmatmul.mubr.msk.f32.gmra.mxu0 %vm354_vm0, %v334_v8  ;;  %1136 = vmatmul.mubr.msk.f32.gmra.mxu1 %vm354_vm0, %v342_v9 }
  0x38   : > { %1126 = vmatprep.mubr.msk.f32.mxu0 %vm354_vm0, %v335_v10  ;;  %1138 = vmatprep.mubr.msk.f32.mxu1 %vm354_vm0, %v343_v11 }
  0x3b   : > { %1127 = vmatmul.mubr.msk.f32.gmra.mxu0 %vm354_vm0, %v336_v12  ;;  %1139 = vmatmul.mubr.msk.f32.gmra.mxu1 %vm354_vm0, %v344_v13 }
  0x3c   : > { %1129 = vmatprep.mubr.msk.f32.mxu0 %vm354_vm0, %v337_v14 }
  0x3f   : > { %1130 = vmatmul.mubr.msk.f32.gmra.mxu0 %vm354_vm0, %v338_v15 }
  0xf3   : > { %v1122_v17 = vpop.f32.mrf.mxu0  ;;  %v1134_v18 = vpop.f32.mrf.mxu1 }
  0xf4   : > { %v469_v19 = vadd.f32 %v1122_v17, %v1056_v16  ;;  %v509_v20 = vadd.f32 %v1134_v18, %v1056_v16 }
  0xf5   : > { %v463_v21 = vpop.f32.mrf.mxu0  ;;  %v503_v22 = vpop.f32.mrf.mxu1 }
  0xf6   : > { %v533_v23 = vmax.f32 %v469_v19, 0.0  ;;  %v541_v24 = vmax.f32 %v509_v20, 0.0  ;;  %v464_v25 = vadd.f32 %v1056_v16, %v463_v21  ;;  %v504_v26 = vadd.f32 %v1056_v16, %v503_v22 }
  0xf7   : > { %v1125_v28 = vpop.f32.mrf.mxu0  ;;  %v1137_v29 = vpop.f32.mrf.mxu1 }
  0xf8   : > { %v532_v30 = vmax.f32 %v464_v25, 0.0  ;;  %v479_v31 = vadd.f32 %v1125_v28, %v1056_v16  ;;  %v519_v32 = vadd.f32 %v1137_v29, %v1056_v16  ;;  %v562_v34 = vmul.f32 %v1555_v27, %v541_v24 }
  0xf9   : > { %v473_v33 = vpop.f32.mrf.mxu0  ;;  %v513_v35 = vpop.f32.mrf.mxu1  ;;  %v554_v36 = vmul.f32 %v1555_v27, %v533_v23  ;;  %v540_v37 = vmax.f32 %v504_v26, 0.0  ;;  %v612_v24 = vstv %s611_s12 }
  0xfa   : > { %v535_v38 = vmax.f32 %v479_v31, 0.0  ;;  %v474_v39 = vadd.f32 %v1056_v16, %v473_v33  ;;  %v543_v40 = vmax.f32 %v519_v32, 0.0  ;;  %v595_v41 = vsel %vm567_vm1, %v562_v34, 0.0 }
  0xfb   : > { %v514_v42 = vadd.f32 %v1056_v16, %v513_v35  ;;  %v571_v43 = vsel %vm567_vm1, %v554_v36, 0.0  ;;  %v1128_v44 = vpop.f32.mrf.mxu0  ;;  %v553_v45 = vmul.f32 %v1555_v27, %v532_v30  ;;  %596 = vadd.xlane.f32.xlu1 %v595_v41  ;;  %v561_v52 = vmul.f32 %v1555_v27, %v540_v37  ;;  %v1140_v57 = vpop.f32.mrf.mxu1 }
  0xfc   : > { %572 = vadd.xlane.f32.xlu0 %v571_v43  ;;  %v556_v46 = vmul.f32 %v1555_v27, %v535_v38  ;;  %v564_v48 = vmul.f32 %v1555_v27, %v543_v40  ;;  %v534_v49 = vmax.f32 %v474_v39, 0.0  ;;  %v489_v51 = vadd.f32 %v1128_v44, %v1056_v16 }
  0xfd   : > { %v483_v47 = vpop.f32.mrf.mxu0  ;;  %v542_v53 = vmax.f32 %v514_v42, 0.0  ;;  %v568_v54 = vsel %vm567_vm1, %v553_v45, 0.0  ;;  %v592_v61 = vsel %vm567_vm1, %v561_v52, 0.0  ;;  %v523_v3 = vpop.f32.mrf.mxu1  ;;  %v529_v4 = vadd.f32 %v1140_v57, %v1056_v16 }
  0xfe   : > { %v577_v50 = vsel %vm567_vm1, %v556_v46, 0.0  ;;  %v484_v55 = vadd.f32 %v1056_v16, %v483_v47  ;;  %v601_v58 = vsel %vm567_vm1, %v564_v48, 0.0  ;;  %v537_v60 = vmax.f32 %v489_v51, 0.0 }
  0xff   : > { %v1131_v56 = vpop.f32.mrf.mxu0  ;;  %578 = vadd.xlane.f32.xlu1 %v577_v50  ;;  %v555_v62 = vmul.f32 %v1555_v27, %v534_v49  ;;  %v563_v2 = vmul.f32 %v1555_v27, %v542_v53  ;;  %v524_v6 = vadd.f32 %v1056_v16, %v523_v3  ;;  %v545_v12 = vmax.f32 %v529_v4, 0.0 }
 0x100   : > { %569 = vadd.xlane.f32.xlu0 %v568_v54  ;;  %v536_v63 = vmax.f32 %v484_v55, 0.0  ;;  %v499_v0 = vadd.f32 %v1131_v56, %v1056_v16  ;;  %v558_v7 = vmul.f32 %v1555_v27, %v537_v60 }
 0x101   : > { %v493_v59 = vpop.f32.mrf.mxu0  ;;  %v574_v5 = vsel %vm567_vm1, %v555_v62, 0.0  ;;  %v598_v10 = vsel %vm567_vm1, %v563_v2, 0.0  ;;  %v544_v13 = vmax.f32 %v524_v6, 0.0  ;;  %v566_v20 = vmul.f32 %v1555_v27, %v545_v12 }
 0x102   : > { %v494_v1 = vadd.f32 %v1056_v16, %v493_v59  ;;  %v539_v8 = vmax.f32 %v499_v0, 0.0  ;;  %v557_v11 = vmul.f32 %v1555_v27, %v536_v63  ;;  %v583_v14 = vsel %vm567_vm1, %v558_v7, 0.0 }
 0x103   : > { %602 = vadd.xlane.f32.xlu1 %v601_v58  ;;  %v565_v21 = vmul.f32 %v1555_v27, %v544_v13  ;;  %v607_v22 = vsel %vm567_vm1, %v566_v20, 0.0 }
 0x104   : > { %593 = vadd.xlane.f32.xlu0 %v592_v61  ;;  %v538_v9 = vmax.f32 %v494_v1, 0.0  ;;  %v580_v15 = vsel %vm567_vm1, %v557_v11, 0.0  ;;  %v560_v17 = vmul.f32 %v1555_v27, %v539_v8 }
 0x105   : > { %v604_v23 = vsel %vm567_vm1, %v565_v21, 0.0 }
 0x106   : > { %v559_v16 = vmul.f32 %v1555_v27, %v538_v9  ;;  %v589_v18 = vsel %vm567_vm1, %v560_v17, 0.0 }
 0x107   : > { %575 = vadd.xlane.f32.xlu1 %v574_v5 }
 0x108   : > { %599 = vadd.xlane.f32.xlu0 %v598_v10  ;;  %v586_v19 = vsel %vm567_vm1, %v559_v16, 0.0 }
 0x10b   : > { %584 = vadd.xlane.f32.xlu1 %v583_v14 }
 0x10c   : > { %581 = vadd.xlane.f32.xlu0 %v580_v15 }
 0x10f   : > { %590 = vadd.xlane.f32.xlu1 %v589_v18 }
 0x110   : > { %587 = vadd.xlane.f32.xlu0 %v586_v19 }
 0x113   : > { %608 = vadd.xlane.f32.xlu1 %v607_v22 }
 0x114   : > { %605 = vadd.xlane.f32.xlu0 %v604_v23 }
 0x184   : > { %v597_v25 = vpop.xlane.xlu1 %596 }
 0x185   : > { %v573_v26 = vpop.xlane.xlu0 %572  ;;  %v622_v28 = vadd.f32 %v612_v24, %v597_v25 }
 0x186   : > { %v614_v29 = vadd.f32 %v612_v24, %v573_v26 }
 0x187   : > { %v1081_v30 = vmul.f32 -1.442695, %v622_v28 }
 0x188   : > { %v1073_v31 = vmul.f32 -1.442695, %v614_v29  ;;  %v579_v32 = vpop.xlane.xlu1 %578 }
 0x189   : > { %v570_v33 = vpop.xlane.xlu0 %569  ;;  %1246 = vpow2.f32 %v1081_v30  ;;  %v616_v27 = vadd.f32 %v612_v24, %v579_v32 }
 0x18a   : > { %v613_v34 = vadd.f32 %v612_v24, %v570_v33  ;;  %1248 = vpow2.f32 %v1073_v31 }
 0x18b   : > { %v1075_v35 = vmul.f32 -1.442695, %v616_v27 }
 0x18c   : > { %v1072_v36 = vmul.f32 -1.442695, %v613_v34  ;;  %v603_v37 = vpop.xlane.xlu1 %602 }
 0x18d   : > { %v594_v38 = vpop.xlane.xlu0 %593  ;;  %1250 = vpow2.f32 %v1075_v35  ;;  %v624_v39 = vadd.f32 %v612_v24, %v603_v37 }
 0x18e   : > { %v621_v40 = vadd.f32 %v612_v24, %v594_v38  ;;  %1252 = vpow2.f32 %v1072_v36 }
 0x18f   : > { %v1083_v41 = vmul.f32 -1.442695, %v624_v39 }
 0x190   : > { %v1080_v42 = vmul.f32 -1.442695, %v621_v40  ;;  %v576_v43 = vpop.xlane.xlu1 %575 }
 0x191   : > { %v600_v44 = vpop.xlane.xlu0 %599  ;;  %1254 = vpow2.f32 %v1083_v41  ;;  %v615_v45 = vadd.f32 %v612_v24, %v576_v43 }
 0x192   : > { %v623_v46 = vadd.f32 %v612_v24, %v600_v44  ;;  %1256 = vpow2.f32 %v1080_v42 }
 0x193   : > { %v1074_v47 = vmul.f32 -1.442695, %v615_v45 }
 0x194   : > { %v1082_v48 = vmul.f32 -1.442695, %v623_v46  ;;  %v585_v49 = vpop.xlane.xlu1 %584 }
 0x195   : > { %v582_v50 = vpop.xlane.xlu0 %581  ;;  %1258 = vpow2.f32 %v1074_v47  ;;  %v618_v51 = vadd.f32 %v612_v24, %v585_v49 }
 0x196   : > { %v617_v52 = vadd.f32 %v612_v24, %v582_v50  ;;  %v1247_v53 = vpop.eup %1246  ;;  %1260 = vpow2.f32 %v1082_v48 }
 0x197   : > { %v1249_v54 = vpop.eup %1248  ;;  %v678_v55 = vadd.f32 1.0, %v1247_v53  ;;  %v1077_v56 = vmul.f32 -1.442695, %v618_v51 }
 0x198   : > { %v670_v57 = vadd.f32 1.0, %v1249_v54  ;;  %v1076_v58 = vmul.f32 -1.442695, %v617_v52  ;;  %v591_v59 = vpop.xlane.xlu1 %590 }
 0x199   : > { %v588_v60 = vpop.xlane.xlu0 %587  ;;  %1262 = vrcp.f32 %v678_v55  ;;  %v620_v61 = vadd.f32 %v612_v24, %v591_v59 }
 0x19a   : > { %v619_v62 = vadd.f32 %v612_v24, %v588_v60  ;;  %v1251_v63 = vpop.eup %1250  ;;  %1264 = vrcp.f32 %v670_v57 }
 0x19b   : > { %v1253_v0 = vpop.eup %1252  ;;  %v672_v1 = vadd.f32 1.0, %v1251_v63  ;;  %1266 = vpow2.f32 %v1077_v56  ;;  %v1079_v2 = vmul.f32 -1.442695, %v620_v61 }
 0x19c   : > { %v669_v3 = vadd.f32 1.0, %v1253_v0  ;;  %1268 = vpow2.f32 %v1076_v58  ;;  %v1078_v4 = vmul.f32 -1.442695, %v619_v62  ;;  %v609_v5 = vpop.xlane.xlu1 %608 }
 0x19d   : > { %v606_v6 = vpop.xlane.xlu0 %605  ;;  %1270 = vrcp.f32 %v672_v1  ;;  %v626_v7 = vadd.f32 %v612_v24, %v609_v5 }
 0x19e   : > { %v625_v8 = vadd.f32 %v612_v24, %v606_v6  ;;  %v1255_v9 = vpop.eup %1254  ;;  %1272 = vrcp.f32 %v669_v3 }
 0x19f   : > { %v1257_v10 = vpop.eup %1256  ;;  %v680_v11 = vadd.f32 1.0, %v1255_v9  ;;  %1274 = vpow2.f32 %v1079_v2  ;;  %v1085_v12 = vmul.f32 -1.442695, %v626_v7 }
 0x1a0   : > { %v677_v13 = vadd.f32 1.0, %v1257_v10  ;;  %1276 = vpow2.f32 %v1078_v4  ;;  %v1084_v14 = vmul.f32 -1.442695, %v625_v8 }
 0x1a1   : > { %1278 = vrcp.f32 %v680_v11 }
 0x1a2   : > { %v1259_v15 = vpop.eup %1258  ;;  %1280 = vrcp.f32 %v677_v13 }
 0x1a3   : > { %v1261_v17 = vpop.eup %1260  ;;  %v671_v16 = vadd.f32 1.0, %v1259_v15  ;;  %1282 = vpow2.f32 %v1085_v12 }
 0x1a4   : > { %v679_v18 = vadd.f32 1.0, %v1261_v17  ;;  %1284 = vpow2.f32 %v1084_v14 }
 0x1a5   : > { %1286 = vrcp.f32 %v671_v16 }
 0x1a6   : > { %v1263_v19 = vpop.eup %1262  ;;  %1288 = vrcp.f32 %v679_v18 }
 0x1a7   : > { %v1265_v20 = vpop.eup %1264  ;;  %721 = vst.msk [vmem:[%s1587_s23 + $0x48] sm:$0xff] %vm711_vm2, %v1263_v19 }
 0x1a8   : > { %v1267_v21 = vpop.eup %1266  ;;  %713 = vst.msk [vmem:[%s1587_s23 + $0x8] sm:$0xff] %vm711_vm2, %v1265_v20 }
 0x1a9   : > { %v1269_v22 = vpop.eup %1268  ;;  %v674_v23 = vadd.f32 1.0, %v1267_v21 }
 0x1aa   : > { %v1271_v24 = vpop.eup %1270  ;;  %v673_v25 = vadd.f32 1.0, %v1269_v22 }
 0x1ab   : > { %v1273_v26 = vpop.eup %1272  ;;  %715 = vst.msk [vmem:[%s1587_s23 + $0x18] sm:$0xff] %vm711_vm2, %v1271_v24  ;;  %1290 = vrcp.f32 %v674_v23 }
 0x1ac   : > { %v1275_v28 = vpop.eup %1274  ;;  %712 = vst.msk [vmem:[%s1587_s23] sm:$0xff] %vm711_vm2, %v1273_v26  ;;  %1292 = vrcp.f32 %v673_v25 }
 0x1ad   : > { %v1277_v29 = vpop.eup %1276  ;;  %v676_v30 = vadd.f32 1.0, %v1275_v28 }
 0x1ae   : > { %v1279_v31 = vpop.eup %1278  ;;  %v675_v32 = vadd.f32 1.0, %v1277_v29 }
 0x1af   : > { %v1281_v33 = vpop.eup %1280  ;;  %723 = vst.msk [vmem:[%s1587_s23 + $0x58] sm:$0xff] %vm711_vm2, %v1279_v31  ;;  %1294 = vrcp.f32 %v676_v30 }
 0x1b0   : > { %v1283_v27 = vpop.eup %1282  ;;  %720 = vst.msk [vmem:[%s1587_s23 + $0x40] sm:$0xff] %vm711_vm2, %v1281_v33  ;;  %1296 = vrcp.f32 %v675_v32 }
 0x1b1   : > { %v1285_v34 = vpop.eup %1284  ;;  %v682_v35 = vadd.f32 1.0, %v1283_v27 }
 0x1b2   : > { %v1287_v36 = vpop.eup %1286  ;;  %v681_v37 = vadd.f32 1.0, %v1285_v34 }
 0x1b3   : > { %v1289_v38 = vpop.eup %1288  ;;  %714 = vst.msk [vmem:[%s1587_s23 + $0x10] sm:$0xff] %vm711_vm2, %v1287_v36  ;;  %1298 = vrcp.f32 %v682_v35 }
 0x1b4   : > { %722 = vst.msk [vmem:[%s1587_s23 + $0x50] sm:$0xff] %vm711_vm2, %v1289_v38  ;;  %1300 = vrcp.f32 %v681_v37 }
 0x1b8   : > { %v1291_v39 = vpop.eup %1290 }
 0x1b9   : > { %v1293_v40 = vpop.eup %1292  ;;  %717 = vst.msk [vmem:[%s1587_s23 + $0x28] sm:$0xff] %vm711_vm2, %v1291_v39 }
 0x1ba   : > { %716 = vst.msk [vmem:[%s1587_s23 + $0x20] sm:$0xff] %vm711_vm2, %v1293_v40 }
 0x1bc   : > { %v1295_v41 = vpop.eup %1294 }
 0x1bd   : > { %v1297_v42 = vpop.eup %1296  ;;  %719 = vst.msk [vmem:[%s1587_s23 + $0x38] sm:$0xff] %vm711_vm2, %v1295_v41 }
 0x1be   : > { %718 = vst.msk [vmem:[%s1587_s23 + $0x30] sm:$0xff] %vm711_vm2, %v1297_v42  ;;  %732 = sbr.rel (!%p1477_p4) target bundleno = 504 (0x1f8), region = 48 }
 0x1c0   : > { %v1299_v43 = vpop.eup %1298 }
 0x1c1   : > { %v1301_v44 = vpop.eup %1300  ;;  %725 = vst.msk [vmem:[%s1587_s23 + $0x68] sm:$0xff] %vm711_vm2, %v1299_v43 }
 0x1c2   : > { %724 = vst.msk [vmem:[%s1587_s23 + $0x60] sm:$0xff] %vm711_vm2, %v1301_v44 }
 0x1c3   : > { %s1724_s16 = smov (!%p735_p6, %s734_s16), 14 }
 0x1c4   : > { %s1086_s21 = sshll.u32 %s1724_s16, 7 }
 0x1c5   : > { %p1089_p7 = scmp.eq.s32.totalorder %s1086_s21, 0 }
 0x1c6   : > { %1302 = sdivrem.u32 (!%p1089_p7), %s1724_s16, 14 }
 0x1c7   : > { %743 = sbr.rel (%p1089_p7) target bundleno = 504 (0x1f8), region = 52 }
 0x1cf   : > { %s1630_s30 = spop.drf %1302 }
 0x1d0   : > { %p1090_p4 = scmp.le.s32.totalorder %s1630_s30, 0 }
 0x1d1   : > { %s1717_s0 = smov (!%p1090_p4), %s1624_s20  ;;  %s1718_s14 = smov (!%p1090_p4), %s1587_s23 }
 0x1d2   : > { %967 = sbr.rel (%p1090_p4) target bundleno = 479 (0x1df), region = 138  ;;  %s1639_s22 = smov (!%p1090_p4), 0  }
 0x1d3   : > { %s1641_s25 = smov (!%p1090_p4), 0  }
 0x1d7 LB: >> { %v834_v45 = vld [vmem:[%s1387_s14] sm:$0xff]  ;;  %v836_v46 = vld [vmem:[%s1387_s14 + $0x8] sm:$0xff]  ;;  %v838_v47 = vld [vmem:[%s1387_s14 + $0x10] sm:$0xff]  ;;  %s862_s27 = sadd.s32 1, %s1391_s22  ;;  %s828_s25 = sadd.s32 1, %s1395_s25   ;;  %s1395_s25 = sphi %s1641_s25, %s828_s25   ;;  %s1391_s22 = sphi %s1639_s22, %s1719_s22   ;;  %s1387_s14 = sphi %s1718_s14, %s867_s14   ;;  %s1383_s0 = sphi %s1717_s0, %s868_s0  }
 0x1d8   : >> { %835 = vst [vmem:[%s1383_s0] sm:$0xff] %v834_v45  ;;  %837 = vst [vmem:[%s1383_s0 + $0x8] sm:$0xff] %v836_v46  ;;  %v840_v48 = vld [vmem:[%s1387_s14 + $0x18] sm:$0xff]  ;;  %v842_v49 = vld [vmem:[%s1387_s14 + $0x20] sm:$0xff]  ;;  %p863_p9 = scmp.ge.s32.totalorder %s862_s27, %s1630_s30  ;;  %p827_p10 = scmp.ge.s32.totalorder %s828_s25, %s1630_s30 }
 0x1d9   : >> { %839 = vst [vmem:[%s1383_s0 + $0x10] sm:$0xff] %v838_v47  ;;  %v844_v50 = vld [vmem:[%s1387_s14 + $0x28] sm:$0xff]  ;;  %841 = vst [vmem:[%s1383_s0 + $0x18] sm:$0xff] %v840_v48  ;;  %v846_v51 = vld [vmem:[%s1387_s14 + $0x30] sm:$0xff] }
 0x1da   : >> { %843 = vst [vmem:[%s1383_s0 + $0x20] sm:$0xff] %v842_v49  ;;  %845 = vst [vmem:[%s1383_s0 + $0x28] sm:$0xff] %v844_v50  ;;  %v848_v52 = vld [vmem:[%s1387_s14 + $0x38] sm:$0xff]  ;;  %v850_v53 = vld [vmem:[%s1387_s14 + $0x40] sm:$0xff]  ;;  %s1726_s27 = smov (%p863_p9, %s862_s27), 0  ;;  %830 = sbr.rel (!%p827_p10) target bundleno = 471 (0x1d7), region = 144 }
 0x1db   : >> { %847 = vst [vmem:[%s1383_s0 + $0x30] sm:$0xff] %v846_v51  ;;  %849 = vst [vmem:[%s1383_s0 + $0x38] sm:$0xff] %v848_v52  ;;  %v852_v54 = vld [vmem:[%s1387_s14 + $0x48] sm:$0xff]  ;;  %v854_v55 = vld [vmem:[%s1387_s14 + $0x50] sm:$0xff]  ;;  %s865_s28 = smul.u32 112, %s1726_s27  ;;  %s1719_s22 = smov %s1726_s27 }
 0x1dc   : >> { %851 = vst [vmem:[%s1383_s0 + $0x40] sm:$0xff] %v850_v53  ;;  %v856_v56 = vld [vmem:[%s1387_s14 + $0x58] sm:$0xff]  ;;  %853 = vst [vmem:[%s1383_s0 + $0x48] sm:$0xff] %v852_v54  ;;  %v858_v57 = vld [vmem:[%s1387_s14 + $0x60] sm:$0xff] }
 0x1dd   : >> { %855 = vst [vmem:[%s1383_s0 + $0x50] sm:$0xff] %v854_v55  ;;  %857 = vst [vmem:[%s1383_s0 + $0x58] sm:$0xff] %v856_v56  ;;  %v860_v58 = vld [vmem:[%s1387_s14 + $0x68] sm:$0xff]  ;;  %s867_s14 = scalar_lea.vmem %s1587_s23, %s865_s28 [#allocation6]  }
 0x1de   : >> { %859 = vst [vmem:[%s1383_s0 + $0x60] sm:$0xff] %v858_v57  ;;  %861 = vst [vmem:[%s1383_s0 + $0x68] sm:$0xff] %v860_v58  ;;  %s868_s0 = scalar_lea.vmem %s1624_s20, %s865_s28  }
 0x1df PF: > { %1304 = sdivrem.u32 %s1724_s16, 14 }
 0x1e0   : > { %s1091_s7 = smul.u32 112, %s1630_s30 }
 0x1e2   : > { %s873_s8 = scalar_lea.vmem %s1587_s23, %s1091_s7 [#allocation6]   ;;  %s875_s9 = scalar_lea.vmem %s1624_s20, %s1091_s7  }
 0x1e8   : > { %s1305_s10 = spop.drf %1304 }
 0x1e9   : > { %p1093_p11 = scmp.le.s32.totalorder %s1305_s10, 0 }
 0x1ea   : > { %s1397_s11 = smov (!%p1093_p11), %s875_s9   ;;  %s1401_s12 = smov (!%p1093_p11), %s873_s8  }
 0x1eb   : > { %981 = sbr.rel (%p1093_p11) target bundleno = 504 (0x1f8), region = 149  ;;  %s1405_s13 = smov (!%p1093_p11), 0  }
 0x1ec   : > { %s1409_s15 = smov (!%p1093_p11), 0  }
 0x1f0 LB: >> { %v885_v59 = vld [vmem:[%s1403_s12] sm:$0xff]  ;;  %s887_s17 = sadd.s32 1, %s1407_s13  ;;  %s879_s15 = sadd.s32 1, %s1411_s15   ;;  %s1411_s15 = sphi %s1409_s15, %s879_s15   ;;  %s1407_s13 = sphi %s1405_s13, %s1406_s13   ;;  %s1403_s12 = sphi %s1401_s12, %s892_s12   ;;  %s1399_s11 = sphi %s1397_s11, %s893_s11  }
 0x1f1   : >> { %886 = vst [vmem:[%s1399_s11] sm:$0xff] %v885_v59  ;;  %p888_p12 = scmp.ge.s32.totalorder %s887_s17, %s1305_s10  ;;  %p878_p13 = scmp.ge.s32.totalorder %s879_s15, %s1305_s10 }
 0x1f3   : >> { %s1728_s17 = smov (%p888_p12, %s887_s17), 0  ;;  %881 = sbr.rel (!%p878_p13) target bundleno = 496 (0x1f0), region = 155 }
 0x1f4   : >> { %s1094_s23 = sshll.u32 %s1728_s17, 3  ;;  %s1406_s13 = smov %s1728_s17  }
 0x1f5   : >> { %s892_s12 = scalar_lea.vmem %s873_s8, %s1094_s23 [#allocation6]   ;;  %s893_s11 = scalar_lea.vmem %s875_s9, %s1094_s23  }
 0x1f8 PF: > { %p15_p0 = scmp.ge.s32.totalorder %s1467_s26, 4   ;;  %s1720_s23 = smov %s1375_s24 }
 0x1f9   : > { %s1721_s24 = smov %s1475_s29  ;;  %s1722_s25 = smov %s1467_s26 }
 0x1fa   :  { %17 = sbr.rel (!%p15_p0) target bundleno = 4 (0x4), region = 166 }
 0x1ff   :  { %909 = vsyncpa [#allocation5], 1 }
 0x200   :  { %911 = vsyncpa [#allocation5 + $0x1], 1 }

</bundles_post_ra>
